<compile_context>
chip_gen: v7x
topology: tpu7x:2x2x1
jax: 0.10.0
libtpu: 0.0.40
codegen_flags: <defaults>
</compile_context>

<pallas_src>
import functools

import jax
import jax.numpy as jnp
from jax.experimental import pallas as pl
from jax.experimental.pallas import tpu as pltpu


def _spatial_gather_kernel(probs_ref, feats_ref, out_ref,
                           acc_ref, m_ref, l_ref,
                           *, scale, n_total, tn, mask_needed):
    # probs_ref: (1, K, tn), feats_ref: (1, C, tn), out_ref: (1, K, C)
    # acc_ref: (K, C) f32, m_ref/l_ref: (K, 1) f32
    n_idx = pl.program_id(1)

    @pl.when(n_idx == 0)
    def _init():
        m_ref[...] = jnp.full_like(m_ref, -jnp.inf)
        l_ref[...] = jnp.zeros_like(l_ref)
        acc_ref[...] = jnp.zeros_like(acc_ref)

    p = probs_ref[0].astype(jnp.float32)                 # (K, tn)
    if scale != 1.0:
        p = p * scale

    f = feats_ref[0]                                     # (C, tn), input dtype

    if mask_needed:
        # Mask out-of-range spatial positions on the (partial) last tile.
        lane = jax.lax.broadcasted_iota(jnp.int32, p.shape, dimension=1)
        valid = (n_idx * tn + lane) < n_total            # (K, tn)
        p = jnp.where(valid, p, -jnp.inf)
        lane_f = jax.lax.broadcasted_iota(jnp.int32, f.shape, dimension=1)
        valid_f = (n_idx * tn + lane_f) < n_total        # (C, tn)
        f = jnp.where(valid_f, f, jnp.zeros_like(f))

    # Online (flash-style) softmax over the spatial axis.
    m_prev = m_ref[...]                                  # (K, 1)
    m_new = jnp.maximum(m_prev, jnp.max(p, axis=-1, keepdims=True))
    alpha = jnp.exp(m_prev - m_new)                      # (K, 1)
    e = jnp.exp(p - m_new)                               # (K, tn), f32

    l_ref[...] = alpha * l_ref[...] + jnp.sum(e, axis=-1, keepdims=True)

    # Contract over the spatial (lane) axis of BOTH operands:
    #   (K, tn) x (C, tn) -> (K, C).  No feats transpose anywhere.
    contrib = jax.lax.dot_general(
        e.astype(f.dtype), f,
        dimension_numbers=(((1,), (1,)), ((), ())),
        preferred_element_type=jnp.float32,
    )
    acc_ref[...] = alpha * acc_ref[...] + contrib
    m_ref[...] = m_new

    @pl.when(n_idx == pl.num_programs(1) - 1)
    def _finalize():
        inv_l = pl.reciprocal(l_ref[...], approx=True)   # (K, 1), EUP
        out_ref[0] = (acc_ref[...] * inv_l).astype(out_ref.dtype)


def _pick_tn(n, c, itemsize):
    """Pick a spatial tile size: ~2 MiB feats (C, tn) tile, lane axis %128."""
    target_bytes = 2 * 1024 * 1024
    tn = (target_bytes // max(1, c * itemsize)) // 128 * 128
    tn = max(tn, 128)
    if tn >= n:
        return n          # single full-extent tile (always a legal block dim)
    return tn


def spatial_gather(feats, probs, scale=1.0, tn=None):
    """feats: (B, C, H, W), probs: (B, K, H, W) -> (B, C, K, 1)."""
    B, C, H, W = feats.shape
    Bp, K, Hp, Wp = probs.shape
    assert B == Bp and (H, W) == (Hp, Wp), "feats/probs batch+spatial mismatch"
    N = H * W

    probs_2d = probs.reshape(B, K, N)      # free reshape
    feats_2d = feats.reshape(B, C, N)      # free reshape -- NO transpose

    if tn is None:
        tn = _pick_tn(N, C, jnp.dtype(feats.dtype).itemsize)
    n_tiles = pl.cdiv(N, tn)
    mask_needed = (N % tn) != 0

    kernel = functools.partial(
        _spatial_gather_kernel,
        scale=float(scale), n_total=N, tn=tn, mask_needed=mask_needed)

    ctx = pl.pallas_call(
        kernel,
        out_shape=jax.ShapeDtypeStruct((B, K, C), feats.dtype),
        grid_spec=pltpu.PrefetchScalarGridSpec(
            num_scalar_prefetch=0,
            grid=(B, n_tiles),
            in_specs=[
                pl.BlockSpec((1, K, tn), lambda b, n: (b, 0, n)),
                pl.BlockSpec((1, C, tn), lambda b, n: (b, 0, n)),
            ],
            out_specs=pl.BlockSpec((1, K, C), lambda b, n: (b, 0, 0)),
            scratch_shapes=[
                pltpu.VMEM((K, C), jnp.float32),   # accumulator
                pltpu.VMEM((K, 1), jnp.float32),   # running max
                pltpu.VMEM((K, 1), jnp.float32),   # running sum
            ],
        ),
        compiler_params=pltpu.CompilerParams(
            dimension_semantics=("parallel", "arbitrary"),
        ),
    )(probs_2d, feats_2d)                   # (B, K, C)

    # Tiny glue on a K*C-sized result: (B, K, C) -> (B, C, K) -> (B, C, K, 1)
    return ctx.transpose(0, 2, 1)[..., None]
    # TODO(synk): for v7x with B == 1, add a "parallel" C-split grid axis so
    # both TensorCores are used.


def _reference(feats, probs, scale=1.0):
    B, C, H, W = feats.shape
    K = probs.shape[1]
    p = probs.reshape(B, K, -1).astype(jnp.float32)
    f = feats.reshape(B, C, -1).transpose(0, 2, 1).astype(jnp.float32)
    p = jax.nn.softmax(scale * p, axis=2)
    out = jnp.einsum("bkn,bnc->bkc", p, f)
    return out.transpose(0, 2, 1)[..., None].astype(feats.dtype)


if __name__ == "__main__":
    key = jax.random.PRNGKey(0)
    k1, k2, k3, k4 = jax.random.split(key, 4)

    # Test A: N divisible by 128, auto tile size (single tile).
    B, C, K, H, W = 2, 32, 5, 16, 16
    feats = jax.random.normal(k1, (B, C, H, W), dtype=jnp.float32)
    probs = jax.random.normal(k2, (B, K, H, W), dtype=jnp.float32)

    out_a = jax.block_until_ready(spatial_gather(feats, probs, scale=1.0))
    ref_a = _reference(feats, probs, scale=1.0)
    assert out_a.shape == (B, C, K, 1), out_a.shape
    assert jnp.allclose(out_a, ref_a, atol=1e-2, rtol=1e-2), "mismatch (A)"

    # Test B: forced multi-tile spatial axis (online-softmax accumulation).
    out_b = jax.block_until_ready(spatial_gather(feats, probs, scale=2.0, tn=128))
    ref_b = _reference(feats, probs, scale=2.0)
    assert jnp.allclose(out_b, ref_b, atol=1e-2, rtol=1e-2), "mismatch (B)"

    # Test C: N not a multiple of the tile (partial last tile -> masking path).
    H2, W2 = 12, 12                      # N = 144
    feats2 = jax.random.normal(k3, (B, C, H2, W2), dtype=jnp.float32)
    probs2 = jax.random.normal(k4, (B, K, H2, W2), dtype=jnp.float32)
    out_c = jax.block_until_ready(spatial_gather(feats2, probs2, scale=1.0, tn=128))
    ref_c = _reference(feats2, probs2, scale=1.0)
    assert jnp.allclose(out_c, ref_c, atol=1e-2, rtol=1e-2), "mismatch (C)"

    print("KERNEL_OK")
</pallas_src>

<mosaic_0001>
module attributes {stable_mosaic.version = 11 : i64} {
  func.func @_spatial_gather_kernel(%arg0: i32, %arg1: i32, %arg2: memref<1x5x256xf32, #tpu.memory_space<vmem>>, %arg3: memref<1x32x256xf32, #tpu.memory_space<vmem>>, %arg4: memref<1x5x32xf32, #tpu.memory_space<vmem>>, %arg5: memref<5x32xf32, #tpu.memory_space<vmem>>, %arg6: memref<5x1xf32, #tpu.memory_space<vmem>>, %arg7: memref<5x1xf32, #tpu.memory_space<vmem>>) attributes {dimension_semantics = [#tpu.dimension_semantics<parallel>, #tpu.dimension_semantics<arbitrary>], iteration_bounds = array<i64: 2, 1>, scalar_prefetch = 0 : i64, scratch_operands = 3 : i64, tpu.core_type = #tpu.core_type<tc>, window_params = [{transform_indices = @transform_0, window_bounds = array<i64: 1, 5, 256>}, {transform_indices = @transform_1, window_bounds = array<i64: 1, 32, 256>}, {transform_indices = @transform_2, window_bounds = array<i64: 1, 5, 32>}]} {
    %c0_i32 = arith.constant 0 : i32
    %0 = arith.cmpi eq, %arg1, %c0_i32 : i32
    %1 = arith.extui %0 : i1 to i32
    %c0_i32_0 = arith.constant 0 : i32
    %2 = arith.cmpi ne, %1, %c0_i32_0 : i32
    scf.if %2 {
      %cst_22 = arith.constant 0xFF800000 : f32
      %32 = vector.broadcast %cst_22 : f32 to vector<5x1xf32>
      %c0_23 = arith.constant 0 : index
      %c0_24 = arith.constant 0 : index
      %33 = vector.load %arg6[%c0_23, %c0_24] : memref<5x1xf32, #tpu.memory_space<vmem>>, vector<5x1xf32>
      tpu.vector_store %arg6[%c0_23, %c0_24], %32 {strides = array<i32>} : memref<5x1xf32, #tpu.memory_space<vmem>>, vector<5x1xf32>,
      %cst_25 = arith.constant 0.000000e+00 : f32
      %34 = vector.broadcast %cst_25 : f32 to vector<5x1xf32>
      %c0_26 = arith.constant 0 : index
      %c0_27 = arith.constant 0 : index
      %35 = vector.load %arg7[%c0_26, %c0_27] : memref<5x1xf32, #tpu.memory_space<vmem>>, vector<5x1xf32>
      tpu.vector_store %arg7[%c0_26, %c0_27], %34 {strides = array<i32>} : memref<5x1xf32, #tpu.memory_space<vmem>>, vector<5x1xf32>,
      %cst_28 = arith.constant 0.000000e+00 : f32
      %36 = vector.broadcast %cst_28 : f32 to vector<5x32xf32>
      %c0_29 = arith.constant 0 : index
      %c0_30 = arith.constant 0 : index
      %37 = vector.load %arg5[%c0_29, %c0_30] : memref<5x32xf32, #tpu.memory_space<vmem>>, vector<5x32xf32>
      tpu.vector_store %arg5[%c0_29, %c0_30], %36 {strides = array<i32>} : memref<5x32xf32, #tpu.memory_space<vmem>>, vector<5x32xf32>,
    } else {
    }
    %c0 = arith.constant 0 : index
    %c0_1 = arith.constant 0 : index
    %c0_2 = arith.constant 0 : index
    %3 = vector.load %arg2[%c0, %c0_1, %c0_2] : memref<1x5x256xf32, #tpu.memory_space<vmem>>, vector<1x5x256xf32>
    %4 = vector.shape_cast %3 : vector<1x5x256xf32> to vector<5x256xf32>
    %c0_3 = arith.constant 0 : index
    %c0_4 = arith.constant 0 : index
    %c0_5 = arith.constant 0 : index
    %5 = vector.load %arg3[%c0_3, %c0_4, %c0_5] : memref<1x32x256xf32, #tpu.memory_space<vmem>>, vector<1x32x256xf32>
    %6 = vector.shape_cast %5 : vector<1x32x256xf32> to vector<32x256xf32>
    %c0_6 = arith.constant 0 : index
    %c0_7 = arith.constant 0 : index
    %7 = vector.load %arg6[%c0_6, %c0_7] : memref<5x1xf32, #tpu.memory_space<vmem>>, vector<5x1xf32>
    %cst = arith.constant dense<0xFF800000> : vector<5xf32>
    %8 = vector.multi_reduction <maximumf>, %4, %cst [1] : vector<5x256xf32> to vector<5xf32>
    %9 = vector.shape_cast %8 : vector<5xf32> to vector<5x1xf32>
    %10 = arith.maximumf %7, %9 : vector<5x1xf32>
    %11 = arith.subf %7, %10 : vector<5x1xf32>
    %12 = math.exp %11 : vector<5x1xf32>
    %13 = vector.broadcast %10 : vector<5x1xf32> to vector<5x256xf32>
    %14 = arith.subf %4, %13 : vector<5x256xf32>
    %15 = math.exp %14 : vector<5x256xf32>
    %c0_8 = arith.constant 0 : index
    %c0_9 = arith.constant 0 : index
    %16 = vector.load %arg7[%c0_8, %c0_9] : memref<5x1xf32, #tpu.memory_space<vmem>>, vector<5x1xf32>
    %17 = arith.mulf %12, %16 : vector<5x1xf32>
    %cst_10 = arith.constant dense<0.000000e+00> : vector<5xf32>
    %18 = vector.multi_reduction <add>, %15, %cst_10 [1] : vector<5x256xf32> to vector<5xf32>
    %19 = vector.shape_cast %18 : vector<5xf32> to vector<5x1xf32>
    %20 = arith.addf %17, %19 : vector<5x1xf32>
    %c0_11 = arith.constant 0 : index
    %c0_12 = arith.constant 0 : index
    %21 = vector.load %arg7[%c0_11, %c0_12] : memref<5x1xf32, #tpu.memory_space<vmem>>, vector<5x1xf32>
    tpu.vector_store %arg7[%c0_11, %c0_12], %20 {strides = array<i32>} : memref<5x1xf32, #tpu.memory_space<vmem>>, vector<5x1xf32>,
    %cst_13 = arith.constant dense<0.000000e+00> : vector<5x32xf32>
    %22 = tpu.matmul %15, %6, %cst_13 {dimension_numbers = #tpu.dot_dimension_numbers<[1], [1], [0], [0], [0, 0, 1, 0], [], []>} : vector<5x256xf32>, vector<32x256xf32>, vector<5x32xf32> -> vector<5x32xf32>
    %c0_14 = arith.constant 0 : index
    %c0_15 = arith.constant 0 : index
    %23 = vector.load %arg5[%c0_14, %c0_15] : memref<5x32xf32, #tpu.memory_space<vmem>>, vector<5x32xf32>
    %24 = vector.broadcast %12 : vector<5x1xf32> to vector<5x32xf32>
    %25 = arith.mulf %24, %23 : vector<5x32xf32>
    %26 = arith.addf %25, %22 : vector<5x32xf32>
    %c0_16 = arith.constant 0 : index
    %c0_17 = arith.constant 0 : index
    %27 = vector.load %arg5[%c0_16, %c0_17] : memref<5x32xf32, #tpu.memory_space<vmem>>, vector<5x32xf32>
    tpu.vector_store %arg5[%c0_16, %c0_17], %26 {strides = array<i32>} : memref<5x32xf32, #tpu.memory_space<vmem>>, vector<5x32xf32>,
    %c0_18 = arith.constant 0 : index
    %c0_19 = arith.constant 0 : index
    %28 = vector.load %arg6[%c0_18, %c0_19] : memref<5x1xf32, #tpu.memory_space<vmem>>, vector<5x1xf32>
    tpu.vector_store %arg6[%c0_18, %c0_19], %10 {strides = array<i32>} : memref<5x1xf32, #tpu.memory_space<vmem>>, vector<5x1xf32>,
    %c0_i32_20 = arith.constant 0 : i32
    %29 = arith.cmpi eq, %arg1, %c0_i32_20 : i32
    %30 = arith.extui %29 : i1 to i32
    %c0_i32_21 = arith.constant 0 : i32
    %31 = arith.cmpi ne, %30, %c0_i32_21 : i32
    scf.if %31 {
      %c0_22 = arith.constant 0 : index
      %c0_23 = arith.constant 0 : index
      %32 = vector.load %arg7[%c0_22, %c0_23] : memref<5x1xf32, #tpu.memory_space<vmem>>, vector<5x1xf32>
      %33 = tpu.reciprocal %32 {approx = true} : vector<5x1xf32> -> vector<5x1xf32>
      %c0_24 = arith.constant 0 : index
      %c0_25 = arith.constant 0 : index
      %34 = vector.load %arg5[%c0_24, %c0_25] : memref<5x32xf32, #tpu.memory_space<vmem>>, vector<5x32xf32>
      %35 = vector.broadcast %33 : vector<5x1xf32> to vector<5x32xf32>
      %36 = arith.mulf %34, %35 : vector<5x32xf32>
      %c0_26 = arith.constant 0 : index
      %c0_27 = arith.constant 0 : index
      %c0_28 = arith.constant 0 : index
      %37 = vector.load %arg4[%c0_26, %c0_27, %c0_28] : memref<1x5x32xf32, #tpu.memory_space<vmem>>, vector<1x5x32xf32>
      %38 = vector.shape_cast %37 : vector<1x5x32xf32> to vector<5x32xf32>
      %39 = vector.shape_cast %36 : vector<5x32xf32> to vector<1x5x32xf32>
      tpu.vector_store %arg4[%c0_26, %c0_27, %c0_28], %39 {strides = array<i32>} : memref<1x5x32xf32, #tpu.memory_space<vmem>>, vector<1x5x32xf32>,
    } else {
    }
    return
  }
  func.func @transform_0(%arg0: i32, %arg1: i32) -> (i32, i32, i32) {
    %c0_i32 = arith.constant 0 : i32
    %c0_i32_0 = arith.constant 0 : i32
    return %arg0, %c0_i32, %arg1 : i32, i32, i32
  }
  func.func @transform_1(%arg0: i32, %arg1: i32) -> (i32, i32, i32) {
    %c0_i32 = arith.constant 0 : i32
    %c0_i32_0 = arith.constant 0 : i32
    return %arg0, %c0_i32, %arg1 : i32, i32, i32
  }
  func.func @transform_2(%arg0: i32, %arg1: i32) -> (i32, i32, i32) {
    %c0_i32 = arith.constant 0 : i32
    %c0_i32_0 = arith.constant 0 : i32
    %c0_i32_1 = arith.constant 0 : i32
    return %arg0, %c0_i32, %c0_i32_0 : i32, i32, i32
  }
}

</mosaic_0001>

<bundles_post_ra>
// kernel: tpu_custom_call.1
= control target key start
LH: loop header
LB: loop body
LE: loop exit
PB: predicated region body
PF: predicated region fallthrough
CT: control target
= control target key end

     0   :  { %7 = vsyncpa [#allocation6], 0  ;;  %s803_s0 = inlined_call_operand.vmem [shape: f32[2,5,256], index: 0, kind: input, shape index: {}]   ;;  %s804_s1 = inlined_call_operand.hbm [shape: f32[2,32,256], index: 1, kind: input, shape index: {}]   ;;  %s805_s2 = inlined_call_operand.vmem [shape: f32[2,5,32], index: 2, kind: output, shape index: {}]  }
   0x1   :  { %9 = vsyncpa [#allocation6 + $0x1], 0  ;;  %s651_s9 = smov 0   ;;  %s653_s10 = smov 0  }
   0x2   :  { %s655_s11 = smov 0   ;;  %s657_s12 = smov 0  }
   0x3   :  { %s659_s13 = smov 0   ;;  %s661_s14 = smov 0  }
   0x4 LB: > { %s454_s15 = sadd.s32 4294967295, %s628_s14   ;;  %s27_s16 = sadd.s32 1, %s624_s13  ;;  %s628_s14 = sphi %s661_s14, %s15_s14   ;;  %s624_s13 = sphi %s659_s13, %s813_s13   ;;  %s620_s12 = sphi %s657_s12, %s812_s12   ;;  %s616_s11 = sphi %s655_s11, %s811_s11   ;;  %s612_s10 = sphi %s653_s10, %s810_s10   ;;  %s608_s9 = sphi %s651_s9, %s809_s9  }
   0x5   : > { %p29_p0 = scmp.ge.s32.totalorder %s27_s16, 2  ;;  %s64_s17 = sadd.s32 1, %s616_s11 }
   0x6   : > { %p71_p1 = scmp.ne.s32.totalorder %s616_s11, %s612_s10  ;;  %p72_p2 = scmp.eq.s32.totalorder %s628_s14, 0 }
   0x7   : > { %s815_s16 = smov (%p29_p0, %s27_s16), 0  ;;  %p77_p4 = scmp.ne.s32.totalorder %s612_s10, %s608_s9 }
   0x8   : > { %p687_p3 = por %p72_p2, %p71_p1  ;;  %s59_s19 = ssub.s32 %s624_s13, %s815_s16 }
   0x9   : > { %p78_p5 = scmp.eq.s32.totalorder %s454_s15, 0  ;;  %p62_p6 = scmp.eq.s32.totalorder %s59_s19, 0 }
   0xa   : > { %p484_p8 = scmp.lt.s32.totalorder %s628_s14, 2  ;;  %s140_s22 = sand.u32 1, %s616_s11  }
   0xb   : > { %p694_p7 = por %p78_p5, %p77_p4  ;;  %s468_s23 = sshll.u32 %s624_s13, 10 }
   0xc   : > { %s700_s21 = scalar_select %p62_p6, %s616_s11, %s64_s17  }
   0xd   : > { %s458_s24 = sshll.u32 %s140_s22, 6  ;;  %s707_s27 = scalar_lea.hbm %s804_s1, %s468_s23 }
   0xe   : > { %s144_s28 = scalar_lea.vmem [#allocation5], %s458_s24  ;;  %p711_p9 = pnand %p484_p8, %p687_p3 }
   0xf   : > { %s153_s29 = sshll.u32 %s144_s28, 4  ;;  %s717_s3 = scalar_lea.sflag [#allocation6], %s140_s22  ;;  %s715_s29 = int_to_ptr.vmem [resolvable:$true] %s153_s29 }
  0x10   : > { %s548_s4 = scalar_lea.hbm %s707_s27, 1024  ;;  %p550_p11 = pneg %p711_p9 }
  0x11   : > { %p549_p10 = scmp.ne.s32.totalorder %s707_s27, %s548_s4  ;;  %s553_s7 = scalar_lea.hbm %s804_s1, 2048 }
  0x12   : > { %p554_p0 = scmp.lt.u32.totalorder %s707_s27, %s804_s1  ;;  %p555_p1 = scmp.lt.u32.totalorder %s553_s7, %s548_s4 }
  0x13   : > { %p551_p12 = pnand %p550_p11, %p549_p10  ;;  %p557_p3 = scmp.lt.u32.totalorder %s548_s4, %s707_s27 }
  0x14   : > { %p556_p2 = por %p555_p1, %p554_p0 }
  0x15   : > { %p552_p13 = pneg %p551_p12 }
  0x16   : > { %p558_p4 = por %p557_p3, %p556_p2 }
  0x18   : > { %p559_p5 = pnand %p558_p4, %p552_p13 }
  0x1a   : > { %562 = shalt.err (!%p559_p5)
}
  0x1b   : > { %s563_s15 = scalar_lea.vmem %s715_s29, 1024  ;;  %s630_s17 = smov [#allocation5]  }
  0x1c   : > { %p564_p6 = scmp.ne.s32.totalorder %s715_s29, %s563_s15  ;;  %s568_s18 = sshll.u32 %s630_s17, 4  ;;  %s569_s18 = int_to_ptr.vmem [resolvable:$false] %s568_s18 }
  0x1d   : > { %s570_s19 = scalar_lea.vmem %s569_s18, 2048  ;;  %p571_p12 = scmp.lt.s32.totalorder %s715_s29, %s569_s18 }
  0x1e   : > { %p566_p8 = pnand %p564_p6, %p550_p11  ;;  %p572_p0 = scmp.lt.s32.totalorder %s570_s19, %s563_s15 }
  0x20   : > { %p567_p10 = pneg %p566_p8  ;;  %p573_p1 = por %p572_p0, %p571_p12 }
  0x22   : > { %p574_p2 = pnand %p573_p1, %p567_p10 }
  0x24   : > { %577 = shalt.err (!%p574_p2)
}
  0x25   : > { %s631_s22 = smov 256   ;;  %s632_s23 = smov 16  }
  0x26   : > { %483 = dma.hbm_to_vmem [thread:$0]  (!%p711_p9), %s707_s27, 1024, %s715_s29, %s717_s3, %s631_s22, %s631_s22, %s632_s23  }
  0x27   : > { %p461_p11 = scmp.ge.s32.totalorder %s628_s14, 1  ;;  %p161_p13 = scmp.lt.s32.totalorder %s628_s14, 3 }
  0x29   : > { %p162_p3 = pnand %p461_p11, %p161_p13 }
  0x2a   : > { %s167_s24 = sand.u32 (!%p162_p3), 1, %s612_s10  }
  0x2b   : > { %165 = sbr.rel (%p162_p3) target bundleno = 645 (0x285), region = 28  ;;  %s462_s25 = sshll.u32 (!%p162_p3), %s167_s24, 6 }
  0x2c   : > { %s168_s26 = scalar_lea.sflag (!%p162_p3), [#allocation6], %s167_s24  ;;  %s748_s28 = scalar_lea.vmem (!%p162_p3), [#allocation5], %s462_s25 }
  0x32   : > { %603 = dma.done.wait (%p694_p7), %s168_s26, 1024  }
  0x33   : > { %605 = vsyncadd (%p694_p7), %s168_s26, 4294966272  ;;  %p201_p4 = scmp.lt.s32.totalorder %s620_s12, 1  ;;  %vm219_vm0 = vcmask 4096   ;;  %v633_v0 = vmov -inf   ;;  %vm235_vm1 = vcmask 1044480   ;;  %v634_v6 = vmov 0  }
  0x34   : > { %220 = vst.msk [vmem:[#allocation3] sm:$0x1f] %vm219_vm0, %v633_v0  ;;  %538 = vset.pattern.permute.xlu0 %v634_v6  ;;  %539 = vset.pattern.permute.xlu1 %v634_v6  ;;  %v635_v7 = vmov 0.0   ;;  %v227_v11 = vld [vmem:[%s748_s28 + $0x8] sm:$0xff]  ;;  %v229_v12 = vld [vmem:[%s748_s28 + $0x18] sm:$0xff]  ;;  %v226_v14 = vld [vmem:[%s748_s28] sm:$0xff] }
  0x35   : > { %s817_s12 = smov (!%p201_p4, %s620_s12), 1  ;;  %221 = vst.msk [vmem:[#allocation4] sm:$0x1f] %vm219_vm0, %v635_v7  ;;  %v470_v13 = vpack.c.bf16 %v229_v12, %v227_v11  ;;  %v228_v15 = vld [vmem:[%s748_s28 + $0x10] sm:$0xff]  ;;  %v231_v18 = vld [vmem:[%s748_s28 + $0x28] sm:$0xff]  ;;  %v233_v19 = vld [vmem:[%s748_s28 + $0x38] sm:$0xff] }
  0x36   : > { %s469_s27 = sshll.u32 %s817_s12, 4  ;;  %v472_v17 = vpack.c.bf16 %v228_v15, %v226_v14  ;;  %v230_v20 = vld [vmem:[%s748_s28 + $0x20] sm:$0xff]  ;;  %v474_v21 = vpack.c.bf16 %v233_v19, %v231_v18  ;;  %v232_v22 = vld [vmem:[%s748_s28 + $0x30] sm:$0xff]  ;;  %vm222_vm2 = vcmask 258048   ;;  %s465_s20 = sshll.u32 %s817_s12, 3 }
  0x37   : > { %s208_s3 = scalar_lea.vmem %s803_s0, %s469_s27  ;;  %471 = vmatprep.subr.bf16.mxu0 %v470_v13  ;;  %v476_v23 = vpack.c.bf16 %v232_v22, %v230_v20  ;;  %223 = vst.msk [vmem:[#allocation2] sm:$0x1f] %vm222_vm2, %v635_v7  ;;  %s214_s6 = scalar_lea.vmem %s805_s2, %s465_s20 }
  0x38   : > { %v224_v1 = vld [vmem:[%s208_s3] sm:$0x1f]  ;;  %v225_v2 = vld [vmem:[%s208_s3 + $0x8] sm:$0x1f]  ;;  %473 = vmatpush1.bf16.xpose.msra.mxu0 %v472_v17 }
  0x39   : > { %v236_v3 = vsel %vm235_vm1, %v224_v1, -inf  ;;  %v237_v4 = vsel %vm235_vm1, %v225_v2, -inf  ;;  %475 = vmatprep.subr.bf16.mxu0 %v474_v21 }
  0x3a   : > { %v238_v5 = vmax.f32 %v236_v3, %v237_v4 }
  0x3b   : > { %v234_v8 = vld [vmem:[#allocation3] sm:$0x1f] }
  0x3c   : > { %239 = vmax.xlane.f32.xlu0 %v238_v5  ;;  %v256_v36 = vld [vmem:[#allocation4] sm:$0x1f] }
  0x3e   : > { %v336_v42 = vld [vmem:[#allocation2] sm:$0x1f] }
  0x40   : > { %477 = vmatpush1.bf16.xpose.msra.mxu0 %v476_v23 }
  0xc9   : > { %v240_v9 = vpop.xlane.xlu0 %239 }
  0xca   : > { %v241_v10 = vmax.f32 %v234_v8, %v240_v9 }
  0xcc   : > { %v242_v16 = vsub.f32 %v234_v8, %v241_v10  ;;  %346 = vst.msk [vmem:[#allocation3] sm:$0x1f] %vm219_vm0, %v241_v10  ;;  %247 = vperm.xlu0 %538, %v241_v10  }
  0xce   : > { %v243_v34 = vmul.f32 1.442695, %v242_v16 }
 0x14b   : > { %v248_v24 = vpop.permute.xlu0 %247 }
 0x14c   : > { %v250_v25 = vsub.f32 %v224_v1, %v248_v24  ;;  %v251_v26 = vsub.f32 %v225_v2, %v248_v24 }
 0x14e   : > { %v252_v27 = vmul.f32 1.442695, %v250_v25  ;;  %v254_v28 = vmul.f32 1.442695, %v251_v26 }
 0x150   : > { %540 = vpow2.f32 %v252_v27 }
 0x151   : > { %542 = vpow2.f32 %v254_v28 }
 0x152   : > { %544 = vpow2.f32 %v243_v34 }
 0x15a   : > { %v541_v29 = vpop.eup %540 }
 0x15b   : > { %v543_v30 = vpop.eup %542  ;;  %v258_v31 = vsel %vm235_vm1, %v541_v29, 0.0 }
 0x15c   : > { %330 = vmatprep.mubr.f32.mxu0 %v543_v30  ;;  %v259_v32 = vsel %vm235_vm1, %v543_v30, 0.0  ;;  %v545_v35 = vpop.eup %544 }
 0x15d   : > { %331 = vmatmul.mubr.f32.vlgmr.msra.gmra.mrb[0].mxu0 %v541_v29  ;;  %v260_v33 = vadd.f32 %v259_v32, %v258_v31  ;;  %v257_v37 = vmul.f32 %v545_v35, %v256_v36 }
 0x15f   : > { %261 = vadd.xlane.f32.xlu1 %v260_v33 }
 0x170   : > { %339 = vperm.xlu1 %539, %v545_v35  }
 0x1ec   : > { %v262_v38 = vpop.xlane.xlu1 %261 }
 0x1ed   : > { %v263_v39 = vadd.f32 %v262_v38, %v257_v37 }
 0x1ef   : > { %265 = vst.msk [vmem:[#allocation4] sm:$0x1f] %vm219_vm0, %v263_v39 }
 0x1f0   : > { %v340_v43 = vpop.permute.xlu1 %339 }
 0x1f1   : > { %v342_v44 = vmul.f32 %v340_v43, %v336_v42 }
 0x1f6   : > { %v350_v40 = vld [vmem:[#allocation4] sm:$0x1f] }
 0x1f7   : > { %546 = vrcp.f32 %v350_v40 }
 0x201   : > { %v547_v41 = vpop.eup %546 }
 0x202   : > { %355 = vperm.xlu1 %539, %v547_v41  }
 0x230   : > { %v332_v45 = vpop.f32.mrb[0].mxu0 }
 0x231   : > { %v343_v46 = vadd.f32 %v342_v44, %v332_v45  ;;  %v334_v47 = vpop.f32.mrb[1].mxu0 }
 0x233   : > { %345 = vst.msk [vmem:[#allocation2] sm:$0x1f] %vm222_vm2, %v343_v46 }
 0x23a   : > { %v352_v48 = vld [vmem:[#allocation2] sm:$0x1f] }
 0x281   : > { %v356_v49 = vpop.permute.xlu1 %355 }
 0x282   : > { %v358_v50 = vmul.f32 %v356_v49, %v352_v48 }
 0x284   : > { %359 = vst.msk [vmem:[%s214_s6] sm:$0x1f] %vm222_vm2, %v358_v50 }
 0x285 PF: > { %s15_s14 = sadd.s32 1, %s628_s14   ;;  %s809_s9 = smov %s612_s10 }
 0x286   : > { %p12_p7 = scmp.ge.s32.totalorder %s15_s14, 4   ;;  %s810_s10 = smov %s616_s11 }
 0x287   : > { %s811_s11 = smov %s700_s21  ;;  %s812_s12 = smov %s624_s13 }
 0x288   : > { %s813_s13 = smov %s815_s16  ;;  %14 = sbr.rel (!%p12_p7) target bundleno = 4 (0x4), region = 79 }
 0x28f   :  { %379 = vsyncpa [#allocation6], 1 }
 0x290   :  { %381 = vsyncpa [#allocation6 + $0x1], 1 }

</bundles_post_ra>
